<compile_context>
chip_gen: v5e
topology: v5e:2x2
jax: 0.10.0
libtpu: 0.0.40
codegen_flags: <defaults>
</compile_context>

<pallas_src>
import functools
import math

import jax
import jax.numpy as jnp
from jax import lax
from jax.experimental import pallas as pl
from jax.experimental.pallas import tpu as pltpu

LN_EPS = 1e-5  # nn.LayerNorm default


def _layer_norm_f32(y, gamma, beta):
    mu = jnp.mean(y, axis=-1, keepdims=True)
    var = jnp.mean((y - mu) ** 2, axis=-1, keepdims=True)  # biased, like PyTorch
    return (y - mu) * lax.rsqrt(var + LN_EPS) * gamma + beta


def transformer_block_kernel(num_heads,
                             xq_ref, xkv_ref,
                             wq_ref, bq_ref, wkv_ref, bkv_ref,
                             wo_ref, bo_ref, g1_ref, be1_ref,
                             w1_ref, b1_ref, w2_ref, b2_ref,
                             g2_ref, be2_ref, o_ref):
    xq = xq_ref[...]                 # (TQ, E) bf16 — this step's query rows
    xkv = xkv_ref[...]               # (S,  E) bf16 — full sequence for K/V
    TQ, E = xq.shape
    Dh = E // num_heads
    scale = 1.0 / math.sqrt(Dh)

    # ---- QKV projections: full contraction width K=E, bf16 MXU, f32 acc ----
    q = jnp.dot(xq, wq_ref[...], preferred_element_type=jnp.float32) + bq_ref[...]
    kv = jnp.dot(xkv, wkv_ref[...], preferred_element_type=jnp.float32) + bkv_ref[...]
    k = kv[:, :E]
    v = kv[:, E:]

    # Head-batched (H, rows, Dh) views via static lane slices + leading-dim stack.
    qh = jnp.stack([(q[:, h * Dh:(h + 1) * Dh] * scale).astype(jnp.bfloat16)
                    for h in range(num_heads)], axis=0)          # (H, TQ, Dh)
    kh = jnp.stack([k[:, h * Dh:(h + 1) * Dh].astype(jnp.bfloat16)
                    for h in range(num_heads)], axis=0)          # (H, S, Dh)
    vh = jnp.stack([v[:, h * Dh:(h + 1) * Dh].astype(jnp.bfloat16)
                    for h in range(num_heads)], axis=0)          # (H, S, Dh)

    # ---- scaled dot-product attention, all heads in one batched matmul ----
    s = jnp.einsum('hqd,hkd->hqk', qh, kh,
                   preferred_element_type=jnp.float32)           # (H, TQ, S) f32
    s = s - jnp.max(s, axis=-1, keepdims=True)
    p = jnp.exp(s)
    p = p * pl.reciprocal(jnp.sum(p, axis=-1, keepdims=True), approx=True)
    ctx = jnp.einsum('hqk,hkd->hqd', p.astype(jnp.bfloat16), vh,
                     preferred_element_type=jnp.float32)         # (H, TQ, Dh)

    # Merge heads back to (TQ, E) and do ONE full-width out-projection (K=E).
    ctx2d = jnp.concatenate([ctx[h] for h in range(num_heads)], axis=-1)
    attn = jnp.dot(ctx2d.astype(jnp.bfloat16), wo_ref[...],
                   preferred_element_type=jnp.float32) + bo_ref[...]
    # TODO(synk): attention-weight dropout and output dropout are stochastic;
    # treated as identity (eval mode).

    # ---- residual + LayerNorm1 (f32 stats) ----
    y = xq.astype(jnp.float32) + attn
    y = _layer_norm_f32(y, g1_ref[...], be1_ref[...])

    # ---- feed-forward: Linear -> GELU(exact erf, matches nn.GELU) -> Linear ----
    h1 = jnp.dot(y.astype(jnp.bfloat16), w1_ref[...],
                 preferred_element_type=jnp.float32) + b1_ref[...]
    h1 = 0.5 * h1 * (1.0 + lax.erf(h1 * (1.0 / math.sqrt(2.0))))
    ff = jnp.dot(h1.astype(jnp.bfloat16), w2_ref[...],
                 preferred_element_type=jnp.float32) + b2_ref[...]

    # ---- residual + LayerNorm2 ----
    o_ref[...] = _layer_norm_f32(y + ff, g2_ref[...], be2_ref[...])


def transformer_block(x, params, num_heads):
    B, S, E = x.shape
    assert E % num_heads == 0
    f32, bf16 = jnp.float32, jnp.bfloat16

    # Query-row tile size (falls back to full S if no nice divisor).
    TQ = next((t for t in (256, 128, 64, 32, 16, 8) if S % t == 0), S)
    nQ = S // TQ

    # ---- host-side weight plumbing: transpose to x@W layout, cast to bf16 ----
    w_in_t = params["w_in"].T                                    # (E, 3E)
    wq = w_in_t[:, :E].astype(bf16)                              # (E, E)
    wkv = w_in_t[:, E:].astype(bf16)                             # (E, 2E)
    b_in = params["b_in"].reshape(1, 3 * E).astype(f32)
    bq, bkv = b_in[:, :E], b_in[:, E:]
    wo = params["w_out"].T.astype(bf16)                          # (E, E)
    bo = params["b_out"].reshape(1, E).astype(f32)
    w1 = params["w1"].T.astype(bf16)                             # (E, Hff)
    b1 = params["b1"].reshape(1, -1).astype(f32)
    w2 = params["w2"].T.astype(bf16)                             # (Hff, E)
    b2 = params["b2"].reshape(1, E).astype(f32)
    g1 = params["g1"].reshape(1, E).astype(f32)
    be1 = params["be1"].reshape(1, E).astype(f32)
    g2 = params["g2"].reshape(1, E).astype(f32)
    be2 = params["be2"].reshape(1, E).astype(f32)
    x_b = x.astype(bf16)                                         # halve DMA bytes

    weights = [wq, bq, wkv, bkv, wo, bo, g1, be1, w1, b1, w2, b2, g2, be2]

    def wspec(shape):
        nd = len(shape)
        return pl.BlockSpec(shape, lambda b, q: (0,) * nd)       # resident block

    in_specs = [
        pl.BlockSpec((None, TQ, E), lambda b, q: (b, q, 0)),     # query-row tile
        pl.BlockSpec((None, S, E), lambda b, q: (b, 0, 0)),      # full seq (K/V)
    ] + [wspec(w.shape) for w in weights]

    kern = functools.partial(transformer_block_kernel, num_heads)

    # NOTE: for very large FFN hidden dims an extra grid axis tiling Hff (with an
    # f32 scratch accumulator) would further bound VMEM; bf16 weights + the raised
    # scoped-VMEM limit are sufficient at ViT-Base-scale sizes.
    return pl.pallas_call(
        kern,
        out_shape=jax.ShapeDtypeStruct((B, S, E), jnp.float32),
        grid_spec=pltpu.PrefetchScalarGridSpec(
            num_scalar_prefetch=0,
            grid=(B, nQ),
            in_specs=in_specs,
            out_specs=pl.BlockSpec((None, TQ, E), lambda b, q: (b, q, 0)),
        ),
        compiler_params=pltpu.CompilerParams(
            dimension_semantics=("parallel", "parallel"),
            vmem_limit_bytes=64 * 1024 * 1024),
    )(x_b, x_b, *weights)


def init_params(key, embed_dim, ff_hid_dim):
    E, H = embed_dim, ff_hid_dim
    ks = jax.random.split(key, 8)
    s = 0.05
    return {
        # nn.MultiheadAttention packed in-projection: (3E, E) weight, (3E,) bias
        "w_in": jax.random.normal(ks[0], (3 * E, E), jnp.float32) * s,
        "b_in": jax.random.normal(ks[1], (1, 3 * E), jnp.float32) * s,
        "w_out": jax.random.normal(ks[2], (E, E), jnp.float32) * s,
        "b_out": jax.random.normal(ks[3], (1, E), jnp.float32) * s,
        "g1": jnp.ones((1, E), jnp.float32),
        "be1": jnp.zeros((1, E), jnp.float32),
        # ff: Linear(E->H), GELU, Linear(H->E); PyTorch Linear weight is (out, in)
        "w1": jax.random.normal(ks[4], (H, E), jnp.float32) * s,
        "b1": jax.random.normal(ks[5], (1, H), jnp.float32) * s,
        "w2": jax.random.normal(ks[6], (E, H), jnp.float32) * s,
        "b2": jax.random.normal(ks[7], (1, E), jnp.float32) * s,
        "g2": jnp.ones((1, E), jnp.float32),
        "be2": jnp.zeros((1, E), jnp.float32),
    }


def reference(x, params, num_heads):
    """Pure-JAX f32 reference mirroring the PyTorch forward (dropout = identity)."""
    B, S, E = x.shape
    Dh = E // num_heads
    scale = 1.0 / math.sqrt(Dh)
    qkv = jnp.einsum("bse,fe->bsf", x, params["w_in"]) + params["b_in"][0]
    q, k, v = jnp.split(qkv, 3, axis=-1)

    def heads(t):
        return t.reshape(B, S, num_heads, Dh).transpose(0, 2, 1, 3)

    s = jnp.einsum("bhqd,bhkd->bhqk", heads(q) * scale, heads(k))
    p = jax.nn.softmax(s, axis=-1)
    o = jnp.einsum("bhqk,bhkd->bhqd", p, heads(v)).transpose(0, 2, 1, 3).reshape(B, S, E)
    attn = jnp.einsum("bse,fe->bsf", o, params["w_out"]) + params["b_out"][0]
    y = _layer_norm_f32(x + attn, params["g1"][0], params["be1"][0])
    h1 = jnp.einsum("bse,fe->bsf", y, params["w1"]) + params["b1"][0]
    h1 = 0.5 * h1 * (1.0 + lax.erf(h1 / math.sqrt(2.0)))
    ff = jnp.einsum("bsh,eh->bse", h1, params["w2"]) + params["b2"][0]
    return _layer_norm_f32(y + ff, params["g2"][0], params["be2"][0])


if __name__ == "__main__":
    B, S, E, NUM_HEADS, FF_HID = 2, 8, 32, 4, 64
    key = jax.random.PRNGKey(0)
    kx, kp = jax.random.split(key)
    x = jax.random.normal(kx, (B, S, E), jnp.float32)
    params = init_params(kp, E, FF_HID)

    out = transformer_block(x, params, NUM_HEADS)
    out = jax.block_until_ready(out)

    ref = reference(x, params, NUM_HEADS)
    err = float(jnp.max(jnp.abs(out - ref)))
    assert out.shape == (B, S, E), out.shape
    # bf16 MXU path vs f32 reference: tolerance loosened accordingly.
    assert err < 5e-2, f"max abs err {err}"
    print("KERNEL_OK")
</pallas_src>

<mosaic_0001>
module attributes {stable_mosaic.version = 11 : i64} {
  func.func @transformer_block_kernel(%arg0: i32, %arg1: i32, %arg2: memref<1x8x32xbf16, #tpu.memory_space<vmem>>, %arg3: memref<1x8x32xbf16, #tpu.memory_space<vmem>>, %arg4: memref<32x32xbf16, #tpu.memory_space<vmem>>, %arg5: memref<1x32xf32, #tpu.memory_space<vmem>>, %arg6: memref<32x64xbf16, #tpu.memory_space<vmem>>, %arg7: memref<1x64xf32, #tpu.memory_space<vmem>>, %arg8: memref<32x32xbf16, #tpu.memory_space<vmem>>, %arg9: memref<1x32xf32, #tpu.memory_space<vmem>>, %arg10: memref<1x32xf32, #tpu.memory_space<vmem>>, %arg11: memref<1x32xf32, #tpu.memory_space<vmem>>, %arg12: memref<32x64xbf16, #tpu.memory_space<vmem>>, %arg13: memref<1x64xf32, #tpu.memory_space<vmem>>, %arg14: memref<64x32xbf16, #tpu.memory_space<vmem>>, %arg15: memref<1x32xf32, #tpu.memory_space<vmem>>, %arg16: memref<1x32xf32, #tpu.memory_space<vmem>>, %arg17: memref<1x32xf32, #tpu.memory_space<vmem>>, %arg18: memref<1x8x32xf32, #tpu.memory_space<vmem>>) attributes {dimension_semantics = [#tpu.dimension_semantics<parallel>, #tpu.dimension_semantics<parallel>], iteration_bounds = array<i64: 2, 1>, scalar_prefetch = 0 : i64, scratch_operands = 0 : i64, tpu.core_type = #tpu.core_type<tc>, window_params = [{transform_indices = @transform_0, window_bounds = array<i64: 1, 8, 32>}, {transform_indices = @transform_1, window_bounds = array<i64: 1, 8, 32>}, {pipeline_mode = #tpu.pipeline_mode<synchronous>, transform_indices = @transform_2, window_bounds = array<i64: 32, 32>}, {pipeline_mode = #tpu.pipeline_mode<synchronous>, transform_indices = @transform_3, window_bounds = array<i64: 1, 32>}, {pipeline_mode = #tpu.pipeline_mode<synchronous>, transform_indices = @transform_4, window_bounds = array<i64: 32, 64>}, {pipeline_mode = #tpu.pipeline_mode<synchronous>, transform_indices = @transform_5, window_bounds = array<i64: 1, 64>}, {pipeline_mode = #tpu.pipeline_mode<synchronous>, transform_indices = @transform_6, window_bounds = array<i64: 32, 32>}, {pipeline_mode = #tpu.pipeline_mode<synchronous>, transform_indices = @transform_7, window_bounds = array<i64: 1, 32>}, {pipeline_mode = #tpu.pipeline_mode<synchronous>, transform_indices = @transform_8, window_bounds = array<i64: 1, 32>}, {pipeline_mode = #tpu.pipeline_mode<synchronous>, transform_indices = @transform_9, window_bounds = array<i64: 1, 32>}, {pipeline_mode = #tpu.pipeline_mode<synchronous>, transform_indices = @transform_10, window_bounds = array<i64: 32, 64>}, {pipeline_mode = #tpu.pipeline_mode<synchronous>, transform_indices = @transform_11, window_bounds = array<i64: 1, 64>}, {pipeline_mode = #tpu.pipeline_mode<synchronous>, transform_indices = @transform_12, window_bounds = array<i64: 64, 32>}, {pipeline_mode = #tpu.pipeline_mode<synchronous>, transform_indices = @transform_13, window_bounds = array<i64: 1, 32>}, {pipeline_mode = #tpu.pipeline_mode<synchronous>, transform_indices = @transform_14, window_bounds = array<i64: 1, 32>}, {pipeline_mode = #tpu.pipeline_mode<synchronous>, transform_indices = @transform_15, window_bounds = array<i64: 1, 32>}, {transform_indices = @transform_16, window_bounds = array<i64: 1, 8, 32>}]} {
    %c0 = arith.constant 0 : index
    %c0_0 = arith.constant 0 : index
    %c0_1 = arith.constant 0 : index
    %0 = vector.load %arg2[%c0, %c0_0, %c0_1] : memref<1x8x32xbf16, #tpu.memory_space<vmem>>, vector<1x8x32xbf16>
    %1 = vector.shape_cast %0 : vector<1x8x32xbf16> to vector<8x32xbf16>
    %c0_2 = arith.constant 0 : index
    %c0_3 = arith.constant 0 : index
    %c0_4 = arith.constant 0 : index
    %2 = vector.load %arg3[%c0_2, %c0_3, %c0_4] : memref<1x8x32xbf16, #tpu.memory_space<vmem>>, vector<1x8x32xbf16>
    %3 = vector.shape_cast %2 : vector<1x8x32xbf16> to vector<8x32xbf16>
    %c0_5 = arith.constant 0 : index
    %c0_6 = arith.constant 0 : index
    %4 = vector.load %arg4[%c0_5, %c0_6] : memref<32x32xbf16, #tpu.memory_space<vmem>>, vector<32x32xbf16>
    %cst = arith.constant dense<0.000000e+00> : vector<8x32xf32>
    %5 = tpu.matmul %1, %4, %cst {dimension_numbers = #tpu.dot_dimension_numbers<[1], [0], [0], [1], [0, 0, 1, 1], [], []>} : vector<8x32xbf16>, vector<32x32xbf16>, vector<8x32xf32> -> vector<8x32xf32>
    %c0_7 = arith.constant 0 : index
    %c0_8 = arith.constant 0 : index
    %6 = vector.load %arg5[%c0_7, %c0_8] : memref<1x32xf32, #tpu.memory_space<vmem>>, vector<1x32xf32>
    %7 = vector.broadcast %6 : vector<1x32xf32> to vector<8x32xf32>
    %8 = arith.addf %5, %7 : vector<8x32xf32>
    %c0_9 = arith.constant 0 : index
    %c0_10 = arith.constant 0 : index
    %9 = vector.load %arg6[%c0_9, %c0_10] : memref<32x64xbf16, #tpu.memory_space<vmem>>, vector<32x64xbf16>
    %cst_11 = arith.constant dense<0.000000e+00> : vector<8x64xf32>
    %10 = tpu.matmul %3, %9, %cst_11 {dimension_numbers = #tpu.dot_dimension_numbers<[1], [0], [0], [1], [0, 0, 1, 1], [], []>} : vector<8x32xbf16>, vector<32x64xbf16>, vector<8x64xf32> -> vector<8x64xf32>
    %c0_12 = arith.constant 0 : index
    %c0_13 = arith.constant 0 : index
    %11 = vector.load %arg7[%c0_12, %c0_13] : memref<1x64xf32, #tpu.memory_space<vmem>>, vector<1x64xf32>
    %12 = vector.broadcast %11 : vector<1x64xf32> to vector<8x64xf32>
    %13 = arith.addf %10, %12 : vector<8x64xf32>
    %14 = vector.extract_strided_slice %13 {offsets = [0, 0], sizes = [8, 32], strides = [1, 1]} : vector<8x64xf32> to vector<8x32xf32>
    %15 = vector.extract_strided_slice %13 {offsets = [0, 32], sizes = [8, 32], strides = [1, 1]} : vector<8x64xf32> to vector<8x32xf32>
    %16 = vector.extract_strided_slice %8 {offsets = [0, 0], sizes = [8, 8], strides = [1, 1]} : vector<8x32xf32> to vector<8x8xf32>
    %cst_14 = arith.constant 0.353553385 : f32
    %17 = vector.broadcast %cst_14 : f32 to vector<8x8xf32>
    %18 = arith.mulf %16, %17 : vector<8x8xf32>
    %19 = arith.truncf %18 : vector<8x8xf32> to vector<8x8xbf16>
    %20 = vector.extract_strided_slice %8 {offsets = [0, 8], sizes = [8, 8], strides = [1, 1]} : vector<8x32xf32> to vector<8x8xf32>
    %cst_15 = arith.constant 0.353553385 : f32
    %21 = vector.broadcast %cst_15 : f32 to vector<8x8xf32>
    %22 = arith.mulf %20, %21 : vector<8x8xf32>
    %23 = arith.truncf %22 : vector<8x8xf32> to vector<8x8xbf16>
    %24 = vector.extract_strided_slice %8 {offsets = [0, 16], sizes = [8, 8], strides = [1, 1]} : vector<8x32xf32> to vector<8x8xf32>
    %cst_16 = arith.constant 0.353553385 : f32
    %25 = vector.broadcast %cst_16 : f32 to vector<8x8xf32>
    %26 = arith.mulf %24, %25 : vector<8x8xf32>
    %27 = arith.truncf %26 : vector<8x8xf32> to vector<8x8xbf16>
    %28 = vector.extract_strided_slice %8 {offsets = [0, 24], sizes = [8, 8], strides = [1, 1]} : vector<8x32xf32> to vector<8x8xf32>
    %cst_17 = arith.constant 0.353553385 : f32
    %29 = vector.broadcast %cst_17 : f32 to vector<8x8xf32>
    %30 = arith.mulf %28, %29 : vector<8x8xf32>
    %31 = arith.truncf %30 : vector<8x8xf32> to vector<8x8xbf16>
    %32 = vector.shape_cast %19 : vector<8x8xbf16> to vector<1x8x8xbf16>
    %33 = vector.shape_cast %23 : vector<8x8xbf16> to vector<1x8x8xbf16>
    %34 = vector.shape_cast %27 : vector<8x8xbf16> to vector<1x8x8xbf16>
    %35 = vector.shape_cast %31 : vector<8x8xbf16> to vector<1x8x8xbf16>
    %36 = tpu.concatenate %32, %33, %34, %35 in 0 : vector<1x8x8xbf16>, vector<1x8x8xbf16>, vector<1x8x8xbf16>, vector<1x8x8xbf16> -> vector<4x8x8xbf16>
    %37 = vector.extract_strided_slice %14 {offsets = [0, 0], sizes = [8, 8], strides = [1, 1]} : vector<8x32xf32> to vector<8x8xf32>
    %38 = arith.truncf %37 : vector<8x8xf32> to vector<8x8xbf16>
    %39 = vector.extract_strided_slice %14 {offsets = [0, 8], sizes = [8, 8], strides = [1, 1]} : vector<8x32xf32> to vector<8x8xf32>
    %40 = arith.truncf %39 : vector<8x8xf32> to vector<8x8xbf16>
    %41 = vector.extract_strided_slice %14 {offsets = [0, 16], sizes = [8, 8], strides = [1, 1]} : vector<8x32xf32> to vector<8x8xf32>
    %42 = arith.truncf %41 : vector<8x8xf32> to vector<8x8xbf16>
    %43 = vector.extract_strided_slice %14 {offsets = [0, 24], sizes = [8, 8], strides = [1, 1]} : vector<8x32xf32> to vector<8x8xf32>
    %44 = arith.truncf %43 : vector<8x8xf32> to vector<8x8xbf16>
    %45 = vector.shape_cast %38 : vector<8x8xbf16> to vector<1x8x8xbf16>
    %46 = vector.shape_cast %40 : vector<8x8xbf16> to vector<1x8x8xbf16>
    %47 = vector.shape_cast %42 : vector<8x8xbf16> to vector<1x8x8xbf16>
    %48 = vector.shape_cast %44 : vector<8x8xbf16> to vector<1x8x8xbf16>
    %49 = tpu.concatenate %45, %46, %47, %48 in 0 : vector<1x8x8xbf16>, vector<1x8x8xbf16>, vector<1x8x8xbf16>, vector<1x8x8xbf16> -> vector<4x8x8xbf16>
    %50 = vector.extract_strided_slice %15 {offsets = [0, 0], sizes = [8, 8], strides = [1, 1]} : vector<8x32xf32> to vector<8x8xf32>
    %51 = arith.truncf %50 : vector<8x8xf32> to vector<8x8xbf16>
    %52 = vector.extract_strided_slice %15 {offsets = [0, 8], sizes = [8, 8], strides = [1, 1]} : vector<8x32xf32> to vector<8x8xf32>
    %53 = arith.truncf %52 : vector<8x8xf32> to vector<8x8xbf16>
    %54 = vector.extract_strided_slice %15 {offsets = [0, 16], sizes = [8, 8], strides = [1, 1]} : vector<8x32xf32> to vector<8x8xf32>
    %55 = arith.truncf %54 : vector<8x8xf32> to vector<8x8xbf16>
    %56 = vector.extract_strided_slice %15 {offsets = [0, 24], sizes = [8, 8], strides = [1, 1]} : vector<8x32xf32> to vector<8x8xf32>
    %57 = arith.truncf %56 : vector<8x8xf32> to vector<8x8xbf16>
    %58 = vector.shape_cast %51 : vector<8x8xbf16> to vector<1x8x8xbf16>
    %59 = vector.shape_cast %53 : vector<8x8xbf16> to vector<1x8x8xbf16>
    %60 = vector.shape_cast %55 : vector<8x8xbf16> to vector<1x8x8xbf16>
    %61 = vector.shape_cast %57 : vector<8x8xbf16> to vector<1x8x8xbf16>
    %62 = tpu.concatenate %58, %59, %60, %61 in 0 : vector<1x8x8xbf16>, vector<1x8x8xbf16>, vector<1x8x8xbf16>, vector<1x8x8xbf16> -> vector<4x8x8xbf16>
    "tpu.trace_start"() <{level = 10 : i32, message = "hqd,hkd->hqk"}> : () -> ()
    %cst_18 = arith.constant dense<0.000000e+00> : vector<4x8x8xf32>
    %63 = tpu.matmul %36, %49, %cst_18 {dimension_numbers = #tpu.dot_dimension_numbers<[2], [2], [1], [1], [0, 0, 0, 1, 1, 1], [0], [0]>} : vector<4x8x8xbf16>, vector<4x8x8xbf16>, vector<4x8x8xf32> -> vector<4x8x8xf32>
    "tpu.trace_stop"() : () -> ()
    %cst_19 = arith.constant dense<0xFF800000> : vector<4x8xf32>
    %64 = vector.multi_reduction <maximumf>, %63, %cst_19 [2] : vector<4x8x8xf32> to vector<4x8xf32>
    %65 = vector.shape_cast %64 : vector<4x8xf32> to vector<4x8x1xf32>
    %66 = vector.broadcast %65 : vector<4x8x1xf32> to vector<4x8x8xf32>
    %67 = arith.subf %63, %66 : vector<4x8x8xf32>
    %68 = math.exp %67 : vector<4x8x8xf32>
    %cst_20 = arith.constant dense<0.000000e+00> : vector<4x8xf32>
    %69 = vector.multi_reduction <add>, %68, %cst_20 [2] : vector<4x8x8xf32> to vector<4x8xf32>
    %70 = vector.shape_cast %69 : vector<4x8xf32> to vector<4x8x1xf32>
    %71 = tpu.reciprocal %70 {approx = true} : vector<4x8x1xf32> -> vector<4x8x1xf32>
    %72 = vector.broadcast %71 : vector<4x8x1xf32> to vector<4x8x8xf32>
    %73 = arith.mulf %68, %72 : vector<4x8x8xf32>
    %74 = arith.truncf %73 : vector<4x8x8xf32> to vector<4x8x8xbf16>
    "tpu.trace_start"() <{level = 10 : i32, message = "hqk,hkd->hqd"}> : () -> ()
    %cst_21 = arith.constant dense<0.000000e+00> : vector<4x8x8xf32>
    %75 = tpu.matmul %74, %62, %cst_21 {dimension_numbers = #tpu.dot_dimension_numbers<[2], [1], [1], [2], [0, 0, 0, 1, 1, 2], [0], [0]>} : vector<4x8x8xbf16>, vector<4x8x8xbf16>, vector<4x8x8xf32> -> vector<4x8x8xf32>
    "tpu.trace_stop"() : () -> ()
    %76 = vector.extract_strided_slice %75 {offsets = [0, 0, 0], sizes = [1, 8, 8], strides = [1, 1, 1]} : vector<4x8x8xf32> to vector<1x8x8xf32>
    %77 = vector.shape_cast %76 : vector<1x8x8xf32> to vector<8x8xf32>
    %78 = vector.extract_strided_slice %75 {offsets = [1, 0, 0], sizes = [1, 8, 8], strides = [1, 1, 1]} : vector<4x8x8xf32> to vector<1x8x8xf32>
    %79 = vector.shape_cast %78 : vector<1x8x8xf32> to vector<8x8xf32>
    %80 = vector.extract_strided_slice %75 {offsets = [2, 0, 0], sizes = [1, 8, 8], strides = [1, 1, 1]} : vector<4x8x8xf32> to vector<1x8x8xf32>
    %81 = vector.shape_cast %80 : vector<1x8x8xf32> to vector<8x8xf32>
    %82 = vector.extract_strided_slice %75 {offsets = [3, 0, 0], sizes = [1, 8, 8], strides = [1, 1, 1]} : vector<4x8x8xf32> to vector<1x8x8xf32>
    %83 = vector.shape_cast %82 : vector<1x8x8xf32> to vector<8x8xf32>
    %84 = tpu.concatenate %77, %79, %81, %83 in 1 : vector<8x8xf32>, vector<8x8xf32>, vector<8x8xf32>, vector<8x8xf32> -> vector<8x32xf32>
    %85 = arith.truncf %84 : vector<8x32xf32> to vector<8x32xbf16>
    %c0_22 = arith.constant 0 : index
    %c0_23 = arith.constant 0 : index
    %86 = vector.load %arg8[%c0_22, %c0_23] : memref<32x32xbf16, #tpu.memory_space<vmem>>, vector<32x32xbf16>
    %cst_24 = arith.constant dense<0.000000e+00> : vector<8x32xf32>
    %87 = tpu.matmul %85, %86, %cst_24 {dimension_numbers = #tpu.dot_dimension_numbers<[1], [0], [0], [1], [0, 0, 1, 1], [], []>} : vector<8x32xbf16>, vector<32x32xbf16>, vector<8x32xf32> -> vector<8x32xf32>
    %c0_25 = arith.constant 0 : index
    %c0_26 = arith.constant 0 : index
    %88 = vector.load %arg9[%c0_25, %c0_26] : memref<1x32xf32, #tpu.memory_space<vmem>>, vector<1x32xf32>
    %89 = vector.broadcast %88 : vector<1x32xf32> to vector<8x32xf32>
    %90 = arith.addf %87, %89 : vector<8x32xf32>
    %91 = arith.extf %1 : vector<8x32xbf16> to vector<8x32xf32>
    %92 = arith.addf %91, %90 : vector<8x32xf32>
    %c0_27 = arith.constant 0 : index
    %c0_28 = arith.constant 0 : index
    %93 = vector.load %arg10[%c0_27, %c0_28] : memref<1x32xf32, #tpu.memory_space<vmem>>, vector<1x32xf32>
    %c0_29 = arith.constant 0 : index
    %c0_30 = arith.constant 0 : index
    %94 = vector.load %arg11[%c0_29, %c0_30] : memref<1x32xf32, #tpu.memory_space<vmem>>, vector<1x32xf32>
    %cst_31 = arith.constant dense<0.000000e+00> : vector<8xf32>
    %95 = vector.multi_reduction <add>, %92, %cst_31 [1] : vector<8x32xf32> to vector<8xf32>
    %96 = vector.shape_cast %95 : vector<8xf32> to vector<8x1xf32>
    %cst_32 = arith.constant 3.200000e+01 : f32
    %97 = vector.broadcast %cst_32 : f32 to vector<8x1xf32>
    %98 = arith.divf %96, %97 : vector<8x1xf32>
    %99 = vector.broadcast %98 : vector<8x1xf32> to vector<8x32xf32>
    %100 = arith.subf %92, %99 : vector<8x32xf32>
    %101 = arith.mulf %100, %100 : vector<8x32xf32>
    %cst_33 = arith.constant dense<0.000000e+00> : vector<8xf32>
    %102 = vector.multi_reduction <add>, %101, %cst_33 [1] : vector<8x32xf32> to vector<8xf32>
    %103 = vector.shape_cast %102 : vector<8xf32> to vector<8x1xf32>
    %cst_34 = arith.constant 3.200000e+01 : f32
    %104 = vector.broadcast %cst_34 : f32 to vector<8x1xf32>
    %105 = arith.divf %103, %104 : vector<8x1xf32>
    %106 = vector.broadcast %98 : vector<8x1xf32> to vector<8x32xf32>
    %107 = arith.subf %92, %106 : vector<8x32xf32>
    %cst_35 = arith.constant 9.99999974E-6 : f32
    %108 = vector.broadcast %cst_35 : f32 to vector<8x1xf32>
    %109 = arith.addf %105, %108 : vector<8x1xf32>
    %110 = math.rsqrt %109 : vector<8x1xf32>
    %111 = vector.broadcast %110 : vector<8x1xf32> to vector<8x32xf32>
    %112 = arith.mulf %107, %111 : vector<8x32xf32>
    %113 = vector.broadcast %93 : vector<1x32xf32> to vector<8x32xf32>
    %114 = arith.mulf %112, %113 : vector<8x32xf32>
    %115 = vector.broadcast %94 : vector<1x32xf32> to vector<8x32xf32>
    %116 = arith.addf %114, %115 : vector<8x32xf32>
    %117 = arith.truncf %116 : vector<8x32xf32> to vector<8x32xbf16>
    %c0_36 = arith.constant 0 : index
    %c0_37 = arith.constant 0 : index
    %118 = vector.load %arg12[%c0_36, %c0_37] : memref<32x64xbf16, #tpu.memory_space<vmem>>, vector<32x64xbf16>
    %cst_38 = arith.constant dense<0.000000e+00> : vector<8x64xf32>
    %119 = tpu.matmul %117, %118, %cst_38 {dimension_numbers = #tpu.dot_dimension_numbers<[1], [0], [0], [1], [0, 0, 1, 1], [], []>} : vector<8x32xbf16>, vector<32x64xbf16>, vector<8x64xf32> -> vector<8x64xf32>
    %c0_39 = arith.constant 0 : index
    %c0_40 = arith.constant 0 : index
    %120 = vector.load %arg13[%c0_39, %c0_40] : memref<1x64xf32, #tpu.memory_space<vmem>>, vector<1x64xf32>
    %121 = vector.broadcast %120 : vector<1x64xf32> to vector<8x64xf32>
    %122 = arith.addf %119, %121 : vector<8x64xf32>
    %cst_41 = arith.constant 5.000000e-01 : f32
    %123 = vector.broadcast %cst_41 : f32 to vector<8x64xf32>
    %124 = arith.mulf %123, %122 : vector<8x64xf32>
    %cst_42 = arith.constant 0.707106769 : f32
    %125 = vector.broadcast %cst_42 : f32 to vector<8x64xf32>
    %126 = arith.mulf %122, %125 : vector<8x64xf32>
    %127 = math.erf %126 : vector<8x64xf32>
    %cst_43 = arith.constant 1.000000e+00 : f32
    %128 = vector.broadcast %cst_43 : f32 to vector<8x64xf32>
    %129 = arith.addf %128, %127 : vector<8x64xf32>
    %130 = arith.mulf %124, %129 : vector<8x64xf32>
    %131 = arith.truncf %130 : vector<8x64xf32> to vector<8x64xbf16>
    %c0_44 = arith.constant 0 : index
    %c0_45 = arith.constant 0 : index
    %132 = vector.load %arg14[%c0_44, %c0_45] : memref<64x32xbf16, #tpu.memory_space<vmem>>, vector<64x32xbf16>
    %cst_46 = arith.constant dense<0.000000e+00> : vector<8x32xf32>
    %133 = tpu.matmul %131, %132, %cst_46 {dimension_numbers = #tpu.dot_dimension_numbers<[1], [0], [0], [1], [0, 0, 1, 1], [], []>} : vector<8x64xbf16>, vector<64x32xbf16>, vector<8x32xf32> -> vector<8x32xf32>
    %c0_47 = arith.constant 0 : index
    %c0_48 = arith.constant 0 : index
    %134 = vector.load %arg15[%c0_47, %c0_48] : memref<1x32xf32, #tpu.memory_space<vmem>>, vector<1x32xf32>
    %135 = vector.broadcast %134 : vector<1x32xf32> to vector<8x32xf32>
    %136 = arith.addf %133, %135 : vector<8x32xf32>
    %137 = arith.addf %116, %136 : vector<8x32xf32>
    %c0_49 = arith.constant 0 : index
    %c0_50 = arith.constant 0 : index
    %138 = vector.load %arg16[%c0_49, %c0_50] : memref<1x32xf32, #tpu.memory_space<vmem>>, vector<1x32xf32>
    %c0_51 = arith.constant 0 : index
    %c0_52 = arith.constant 0 : index
    %139 = vector.load %arg17[%c0_51, %c0_52] : memref<1x32xf32, #tpu.memory_space<vmem>>, vector<1x32xf32>
    %cst_53 = arith.constant dense<0.000000e+00> : vector<8xf32>
    %140 = vector.multi_reduction <add>, %137, %cst_53 [1] : vector<8x32xf32> to vector<8xf32>
    %141 = vector.shape_cast %140 : vector<8xf32> to vector<8x1xf32>
    %cst_54 = arith.constant 3.200000e+01 : f32
    %142 = vector.broadcast %cst_54 : f32 to vector<8x1xf32>
    %143 = arith.divf %141, %142 : vector<8x1xf32>
    %144 = vector.broadcast %143 : vector<8x1xf32> to vector<8x32xf32>
    %145 = arith.subf %137, %144 : vector<8x32xf32>
    %146 = arith.mulf %145, %145 : vector<8x32xf32>
    %cst_55 = arith.constant dense<0.000000e+00> : vector<8xf32>
    %147 = vector.multi_reduction <add>, %146, %cst_55 [1] : vector<8x32xf32> to vector<8xf32>
    %148 = vector.shape_cast %147 : vector<8xf32> to vector<8x1xf32>
    %cst_56 = arith.constant 3.200000e+01 : f32
    %149 = vector.broadcast %cst_56 : f32 to vector<8x1xf32>
    %150 = arith.divf %148, %149 : vector<8x1xf32>
    %151 = vector.broadcast %143 : vector<8x1xf32> to vector<8x32xf32>
    %152 = arith.subf %137, %151 : vector<8x32xf32>
    %cst_57 = arith.constant 9.99999974E-6 : f32
    %153 = vector.broadcast %cst_57 : f32 to vector<8x1xf32>
    %154 = arith.addf %150, %153 : vector<8x1xf32>
    %155 = math.rsqrt %154 : vector<8x1xf32>
    %156 = vector.broadcast %155 : vector<8x1xf32> to vector<8x32xf32>
    %157 = arith.mulf %152, %156 : vector<8x32xf32>
    %158 = vector.broadcast %138 : vector<1x32xf32> to vector<8x32xf32>
    %159 = arith.mulf %157, %158 : vector<8x32xf32>
    %160 = vector.broadcast %139 : vector<1x32xf32> to vector<8x32xf32>
    %161 = arith.addf %159, %160 : vector<8x32xf32>
    %c0_58 = arith.constant 0 : index
    %c0_59 = arith.constant 0 : index
    %c0_60 = arith.constant 0 : index
    %162 = vector.load %arg18[%c0_58, %c0_59, %c0_60] : memref<1x8x32xf32, #tpu.memory_space<vmem>>, vector<1x8x32xf32>
    %163 = vector.shape_cast %162 : vector<1x8x32xf32> to vector<8x32xf32>
    %164 = vector.shape_cast %161 : vector<8x32xf32> to vector<1x8x32xf32>
    tpu.vector_store %arg18[%c0_58, %c0_59, %c0_60], %164 {strides = array<i32>} : memref<1x8x32xf32, #tpu.memory_space<vmem>>, vector<1x8x32xf32>,
    return
  }
  func.func @transform_0(%arg0: i32, %arg1: i32) -> (i32, i32, i32) {
    %c0_i32 = arith.constant 0 : i32
    %c0_i32_0 = arith.constant 0 : i32
    return %arg0, %arg1, %c0_i32 : i32, i32, i32
  }
  func.func @transform_1(%arg0: i32, %arg1: i32) -> (i32, i32, i32) {
    %c0_i32 = arith.constant 0 : i32
    %c0_i32_0 = arith.constant 0 : i32
    %c0_i32_1 = arith.constant 0 : i32
    return %arg0, %c0_i32, %c0_i32_0 : i32, i32, i32
  }
  func.func @transform_2(%arg0: i32, %arg1: i32) -> (i32, i32) {
    %c0_i32 = arith.constant 0 : i32
    %c0_i32_0 = arith.constant 0 : i32
    %c0_i32_1 = arith.constant 0 : i32
    return %c0_i32, %c0_i32_0 : i32, i32
  }
  func.func @transform_3(%arg0: i32, %arg1: i32) -> (i32, i32) {
    %c0_i32 = arith.constant 0 : i32
    %c0_i32_0 = arith.constant 0 : i32
    %c0_i32_1 = arith.constant 0 : i32
    return %c0_i32, %c0_i32_0 : i32, i32
  }
  func.func @transform_4(%arg0: i32, %arg1: i32) -> (i32, i32) {
    %c0_i32 = arith.constant 0 : i32
    %c0_i32_0 = arith.constant 0 : i32
    %c0_i32_1 = arith.constant 0 : i32
    return %c0_i32, %c0_i32_0 : i32, i32
  }
  func.func @transform_5(%arg0: i32, %arg1: i32) -> (i32, i32) {
    %c0_i32 = arith.constant 0 : i32
    %c0_i32_0 = arith.constant 0 : i32
    %c0_i32_1 = arith.constant 0 : i32
    return %c0_i32, %c0_i32_0 : i32, i32
  }
  func.func @transform_6(%arg0: i32, %arg1: i32) -> (i32, i32) {
    %c0_i32 = arith.constant 0 : i32
    %c0_i32_0 = arith.constant 0 : i32
    %c0_i32_1 = arith.constant 0 : i32
    return %c0_i32, %c0_i32_0 : i32, i32
  }
  func.func @transform_7(%arg0: i32, %arg1: i32) -> (i32, i32) {
    %c0_i32 = arith.constant 0 : i32
    %c0_i32_0 = arith.constant 0 : i32
    %c0_i32_1 = arith.constant 0 : i32
    return %c0_i32, %c0_i32_0 : i32, i32
  }
  func.func @transform_8(%arg0: i32, %arg1: i32) -> (i32, i32) {
    %c0_i32 = arith.constant 0 : i32
    %c0_i32_0 = arith.constant 0 : i32
    %c0_i32_1 = arith.constant 0 : i32
    return %c0_i32, %c0_i32_0 : i32, i32
  }
  func.func @transform_9(%arg0: i32, %arg1: i32) -> (i32, i32) {
    %c0_i32 = arith.constant 0 : i32
    %c0_i32_0 = arith.constant 0 : i32
    %c0_i32_1 = arith.constant 0 : i32
    return %c0_i32, %c0_i32_0 : i32, i32
  }
  func.func @transform_10(%arg0: i32, %arg1: i32) -> (i32, i32) {
    %c0_i32 = arith.constant 0 : i32
    %c0_i32_0 = arith.constant 0 : i32
    %c0_i32_1 = arith.constant 0 : i32
    return %c0_i32, %c0_i32_0 : i32, i32
  }
  func.func @transform_11(%arg0: i32, %arg1: i32) -> (i32, i32) {
    %c0_i32 = arith.constant 0 : i32
    %c0_i32_0 = arith.constant 0 : i32
    %c0_i32_1 = arith.constant 0 : i32
    return %c0_i32, %c0_i32_0 : i32, i32
  }
  func.func @transform_12(%arg0: i32, %arg1: i32) -> (i32, i32) {
    %c0_i32 = arith.constant 0 : i32
    %c0_i32_0 = arith.constant 0 : i32
    %c0_i32_1 = arith.constant 0 : i32
    return %c0_i32, %c0_i32_0 : i32, i32
  }
  func.func @transform_13(%arg0: i32, %arg1: i32) -> (i32, i32) {
    %c0_i32 = arith.constant 0 : i32
    %c0_i32_0 = arith.constant 0 : i32
    %c0_i32_1 = arith.constant 0 : i32
    return %c0_i32, %c0_i32_0 : i32, i32
  }
  func.func @transform_14(%arg0: i32, %arg1: i32) -> (i32, i32) {
    %c0_i32 = arith.constant 0 : i32
    %c0_i32_0 = arith.constant 0 : i32
    %c0_i32_1 = arith.constant 0 : i32
    return %c0_i32, %c0_i32_0 : i32, i32
  }
  func.func @transform_15(%arg0: i32, %arg1: i32) -> (i32, i32) {
    %c0_i32 = arith.constant 0 : i32
    %c0_i32_0 = arith.constant 0 : i32
    %c0_i32_1 = arith.constant 0 : i32
    return %c0_i32, %c0_i32_0 : i32, i32
  }
  func.func @transform_16(%arg0: i32, %arg1: i32) -> (i32, i32, i32) {
    %c0_i32 = arith.constant 0 : i32
    %c0_i32_0 = arith.constant 0 : i32
    return %arg0, %arg1, %c0_i32 : i32, i32, i32
  }
}

</mosaic_0001>

<bundles_post_ra>
// kernel: tpu_custom_call.1
= control target key start
LH: loop header
LB: loop body
LE: loop exit
PB: predicated region body
PF: predicated region fallthrough
CT: control target
= control target key end

     0   :  { %s2072_s0 = inlined_call_operand.hbm [shape: bf16[2,8,32], index: 0, kind: input, shape index: {}]   ;;  %s2073_s1 = inlined_call_operand.hbm [shape: bf16[2,8,32], index: 1, kind: input, shape index: {}]   ;;  %s2074_s2 = inlined_call_operand.vmem [shape: bf16[32,32], index: 2, kind: input, shape index: {}]   ;;  %s2075_s3 = inlined_call_operand.vmem [shape: f32[1,32], index: 3, kind: input, shape index: {}]   ;;  %s2076_s4 = inlined_call_operand.vmem [shape: bf16[32,64], index: 4, kind: input, shape index: {}]   ;;  %s2077_s5 = inlined_call_operand.vmem [shape: f32[1,64], index: 5, kind: input, shape index: {}]   ;;  %s2078_s6 = inlined_call_operand.vmem [shape: bf16[32,32], index: 6, kind: input, shape index: {}]   ;;  %s2079_s7 = inlined_call_operand.vmem [shape: f32[1,32], index: 7, kind: input, shape index: {}]   ;;  %s2080_s8 = inlined_call_operand.vmem [shape: f32[1,32], index: 8, kind: input, shape index: {}]   ;;  %s2081_s9 = inlined_call_operand.vmem [shape: f32[1,32], index: 9, kind: input, shape index: {}]   ;;  %s2082_s10 = inlined_call_operand.hbm [shape: bf16[32,64], index: 10, kind: input, shape index: {}]   ;;  %s2083_s11 = inlined_call_operand.vmem [shape: f32[1,64], index: 11, kind: input, shape index: {}]   ;;  %s2084_s12 = inlined_call_operand.vmem [shape: bf16[64,32], index: 12, kind: input, shape index: {}]   ;;  %s2085_s13 = inlined_call_operand.vmem [shape: f32[1,32], index: 13, kind: input, shape index: {}]   ;;  %s2086_s14 = inlined_call_operand.vmem [shape: f32[1,32], index: 14, kind: input, shape index: {}]   ;;  %s2087_s15 = inlined_call_operand.vmem [shape: f32[1,32], index: 15, kind: input, shape index: {}]   ;;  %s2088_s16 = inlined_call_operand.hbm [shape: f32[2,8,32], index: 16, kind: output, shape index: {}]  }
   0x1   :  { %2098 = sst [smem:[#allocation21_spill]] %s2072_s0 }
   0x2   :  { %2099 = sst [smem:[#allocation22_spill]] %s2080_s8 }
   0x3   :  { %2100 = sst [smem:[#allocation23_spill]] %s2081_s9 }
   0x4   :  { %2101 = sst [smem:[#allocation24_spill]] %s2082_s10 }
   0x5   :  { %2102 = sst [smem:[#allocation25_spill]] %s2083_s11 }
   0x6   :  { %2103 = sst [smem:[#allocation26_spill]] %s2084_s12 }
   0x7   :  { %2104 = sst [smem:[#allocation27_spill]] %s2085_s13 }
   0x8   :  { %2105 = sst [smem:[#allocation28_spill]] %s2086_s14 }
   0x9   :  { %2106 = sst [smem:[#allocation29_spill]] %s2087_s15 }
   0xa   :  { %2107 = sst [smem:[#allocation30_spill]] %s2088_s16 }
   0xb   :  { %21 = vsyncpa [#allocation3], 0 }
   0xc   :  { %23 = vsyncpa [#allocation3 + $0x1], 0 }
   0xd   :  { %24 = vsyncpa [#allocation6], 0 }
   0xe   :  { %26 = vsyncpa [#allocation6 + $0x1], 0 }
   0xf   :  { %27 = vsyncpa [#allocation4], 0 }
  0x10   :  { %29 = vsyncpa [#allocation4 + $0x1], 0  ;;  %s1806_s21 = smov 0   ;;  %s1808_s22 = smov 0  }
  0x11   :  { %s1810_s23 = smov 0   ;;  %s1812_s24 = smov 0  }
  0x12   :  { %s1814_s25 = smov 0   ;;  %s1816_s26 = smov 0  }
  0x13 LB: > { %2108 = sst [smem:[#allocation13_spill]] %s1688_s21  ;;  %s1837_s27 = sadd.s32 4294967295, %s1708_s26   ;;  %s1708_s26 = sphi %s1816_s26, %s35_s26   ;;  %s1704_s25 = sphi %s1814_s25, %s2138_s25   ;;  %s1700_s24 = sphi %s1812_s24, %s2137_s24   ;;  %s1696_s23 = sphi %s1810_s23, %s2136_s23   ;;  %s1692_s22 = sphi %s1808_s22, %s2140_s22   ;;  %s1688_s21 = sphi %s1806_s21, %s2139_s21  }
  0x14   : > { %2109 = sst [smem:[#allocation14_spill]] %s1696_s23  ;;  %p1317_p0 = scmp.ge.s32.totalorder %s1708_s26, 1 }
  0x15   : > { %2110 = sst [smem:[#allocation15_spill]] %s1700_s24  ;;  %p70_p1 = scmp.eq.s32.totalorder %s1837_s27, 0 }
  0x16   : > { %2111 = sst [smem:[#allocation16_spill]] %s1704_s25  ;;  %p428_p2 = scmp.lt.s32.totalorder %s1708_s26, 3 }
  0x17   : > { %s2112_s10 = sld [smem:[#allocation24_spill]]  ;;  %s1710_s17 = smov [#allocation7]  }
  0x18   : > { %p1845_p3 = pnand %p1317_p0, %p428_p2  ;;  %s465_s18 = sshll.u32 %s1710_s17, 4  ;;  %s466_s18 = int_to_ptr.vmem [resolvable:$true] %s465_s18 }
  0x19   : > { %p1319_p6 = scmp.ge.s32.totalorder %s1708_s26, 2  ;;  %s1711_s19 = smov 64  }
  0x1a   : > { %p1417_p4 = pneg %p1845_p3  ;;  %s1712_s20 = smov 4  }
  0x1b   : > { %s1316_s28 = sadd.s32 4294967294, %s1708_s26   ;;  %s47_s29 = sadd.s32 1, %s1704_s25 }
  0x1c   : > { %p1418_p5 = pnand %p1417_p4, %p70_p1  ;;  %p49_p7 = scmp.ge.s32.totalorder %s47_s29, 2 }
  0x1d   : > { %s463_s30 = sshll.u32 %s2112_s10, 4  ;;  %s56_s10 = sadd.s32 1, %s1696_s23  ;;  %s464_s30 = int_to_ptr.hbm [resolvable:$true] %s463_s30 }
  0x1e   : > { %1420 = dma.hbm_to_vmem [thread:$0]  (!%p1418_p5), %s464_s30, 256, %s466_s18, [#allocation6], %s1711_s19, %s1711_s19, %s1712_s20  }
  0x1f   : > { %p63_p8 = scmp.ne.s32.totalorder %s1696_s23, %s1692_s22  ;;  %p64_p9 = scmp.eq.s32.totalorder %s1708_s26, 0 }
  0x20   : > { %p69_p10 = scmp.ne.s32.totalorder %s1692_s22, %s1688_s21  ;;  %s2142_s29 = smov (%p49_p7, %s47_s29), 0 }
  0x21   : > { %2114 = sst [smem:[#allocation17_spill]] %s2142_s29  ;;  %p1864_p11 = por %p64_p9, %p63_p8 }
  0x22   : > { %p1870_p12 = por %p70_p1, %p69_p10  ;;  %s51_s18 = ssub.s32 %s1704_s25, %s2142_s29 }
  0x23   : > { %p415_p13 = scmp.eq.s32.totalorder %s1837_s27, 1  ;;  %p54_p0 = scmp.eq.s32.totalorder %s51_s18, 0 }
  0x24   : > { %p421_p2 = scmp.eq.s32.totalorder %s1316_s28, 1  ;;  %p1433_p5 = scmp.lt.s32.totalorder %s1708_s26, 2 }
  0x25   : > { %p1877_p4 = por %p415_p13, %p63_p8  ;;  %s494_s15 = sand.u32 1, %s1696_s23  }
  0x26   : > { %s1883_s20 = scalar_select %p54_p0, %s1696_s23, %s56_s10  }
  0x27   : > { %s2117_s19 = scalar_select %p1877_p4, 1, 0 }
  0x28   : > { %2119 = sst [smem:[#allocation19_spill]] %s1883_s20  ;;  %p1885_p7 = por %p421_p2, %p69_p10 }
  0x29   : > { %2118 = sst [smem:[#allocation18_spill]] %s2117_s19  ;;  %s1320_s16 = sshll.u32 %s494_s15, 2 }
  0x2a   : > { %s2120_s21 = scalar_select %p1885_p7, 1, 0 }
  0x2b   : > { %s1321_s14 = sshll.u32 %s1704_s25, 2  ;;  %s2122_s13 = sld [smem:[#allocation21_spill]] }
  0x2c   : > { %2121 = sst [smem:[#allocation20_spill]] %s2120_s21  ;;  %s498_s28 = scalar_lea.vmem [#allocation2], %s1320_s16 }
  0x2d   : > { %s507_s12 = sshll.u32 %s498_s28, 4  ;;  %p1422_p8 = pnand %p1433_p5, %p1864_p11  ;;  %s508_s12 = int_to_ptr.vmem [resolvable:$true] %s507_s12 }
  0x2e   : > { %s522_s19 = scalar_lea.hbm %s2073_s1, %s1321_s14  ;;  %s514_s9 = sand.u32 1, %s1708_s26  }
  0x2f   : > { %s495_s21 = scalar_lea.sflag [#allocation3], %s494_s15  ;;  %s524_s23 = sshll.u32 %s522_s19, 4  ;;  %s525_s23 = int_to_ptr.hbm [resolvable:$true] %s524_s23 }
  0x30   : > { %s518_s25 = scalar_lea.vmem [#allocation5], %s1320_s16  ;;  %535 = sbr.rel (%p1845_p3) target bundleno = 1961 (0x7a9), region = 84 }
  0x31   : > { %s503_s18 = scalar_lea.hbm %s2122_s13, %s1321_s14  ;;  %s526_s8 = sshll.u32 %s518_s25, 4  ;;  %s527_s8 = int_to_ptr.vmem [resolvable:$true] %s526_s8 }
  0x32   : > { %s505_s11 = sshll.u32 %s503_s18, 4  ;;  %s515_s13 = scalar_lea.sflag [#allocation6], %s514_s9  ;;  %s506_s11 = int_to_ptr.hbm [resolvable:$true] %s505_s11 }
  0x33   : > { %1424 = dma.hbm_to_vmem [thread:$0]  (!%p1422_p8), %s506_s11, 64, %s508_s12, %s495_s21  }
  0x34   : > { %1427 = dma.hbm_to_vmem [thread:$0]  (!%p1422_p8), %s525_s23, 64, %s527_s8, %s515_s13  }
  0x35   : > { %s1903_s24 = sand.u32 1, %s1692_s22  }
  0x36   : > { %s1325_s14 = sshll.u32 %s1903_s24, 2  ;;  %s538_s29 = scalar_lea.sflag [#allocation3], %s1903_s24 }
  0x37   : > { %s541_s15 = scalar_lea.vmem [#allocation2], %s1325_s14 }
  0x38   : > { %1671 = dma.done.wait (%p1870_p12), %s538_s29, 64  }
  0x39   : > { %1673 = vsyncadd (%p1870_p12), %s538_s29, 4294967232  ;;  %s547_s8 = sand.u32 1, %s1837_s27   ;;  %s551_s11 = scalar_lea.vmem [#allocation5], %s1325_s14 }
  0x3a   : > { %s548_s9 = scalar_lea.sflag [#allocation6], %s547_s8 }
  0x3b   : > { %1675 = dma.done.wait (%p1870_p12), %s548_s9, 64  }
  0x3c   : > { %1677 = vsyncadd (%p1870_p12), %s548_s9, 4294967232 }
  0x3d   : > { %1679 = dma.done.wait (%p70_p1), [#allocation6], 256  }
  0x3e   : > { %1681 = vsyncadd (%p70_p1), [#allocation6], 4294967040  ;;  %v1398_v0 = vld [vmem:[%s2076_s4 + $0x8] sm:$0xff]  ;;  %v1397_v2 = vld [vmem:[%s2076_s4] sm:$0xff]  ;;  %vm634_vm0 = vcmask 261120   ;;  %vm704_vm1 = vcmask 64512  }
  0x3f   : > { %v1396_v1 = vld [vmem:[%s2074_s2 + $0x8] sm:$0xff]  ;;  %680 = vmatpush.bf16.msra.mxu1 %v1398_v0  ;;  %v1395_v3 = vld [vmem:[%s2074_s2] sm:$0xff]  ;;  %s1713_s28 = smov 112   ;;  %s1714_s10 = smov 120   ;;  %vm836_vm2 = vcmask 1043456   ;;  %vm935_vm3 = vcmask 130048  }
  0x40   : > { %644 = vmatpush.bf16.msra.mxu0 %v1396_v1  ;;  %v613_v4 = vld [vmem:[%s551_s11] sm:$0xf]  ;;  %v1932_v5 = vld [vmem:[%s541_s15] sm:$0xf]  ;;  %s1715_s13 = smov 104   ;;  %s1716_s14 = smov 96  }
  0x41   : > { %v1495_v6 = vld [vmem:[%s2077_s5] ss:$0 sm:$0xff]  ;;  %s1717_s29 = smov 16   ;;  %s1718_s15 = smov 8   ;;  %vm937_vm4 = vcmask 195584   ;;  %vm1135_vm13 = vcmask 523264  }
  0x42   : > { %v1496_v7 = vld [vmem:[%s2075_s3] ss:$0 sm:$0xff]  ;;  %s1719_s8 = smov 24   ;;  %s2123_s17 = sld [smem:[#allocation22_spill]] }
  0x43   : > { %681 = vmatpush.bf16.msra.mxu1 %v1397_v2  ;;  %s2124_s19 = sld [smem:[#allocation23_spill]]  ;;  %s1328_s0 = sshll.u32 %s1903_s24, 3 }
  0x44   : > { %645 = vmatpush.bf16.msra.mxu0 %v1395_v3  ;;  %s2127_s23 = sld [smem:[#allocation27_spill]]  ;;  %s610_s9 = scalar_lea.vmem [#allocation8], %s1328_s0 }
  0x45   : > { %s2128_s25 = sld [smem:[#allocation15_spill]]  ;;  %s1200_s11 = sshll.u32 %s610_s9, 4  ;;  %s1201_s11 = int_to_ptr.vmem [resolvable:$true] %s1200_s11 }
  0x46   : > { %1346 = vmatmul.msk.bf16.vlgmr.msra.gmra.mxu1 %vm634_vm0, %v613_v4  ;;  %s1187_s16 = scalar_lea.sflag [#allocation4], %s1903_s24 }
  0x47   : > { %1337 = vmatmul.msk.bf16.vlgmr.msra.gmra.mxu0 %vm634_vm0, %v1932_v5 }
  0xc3   : > { %v683_v8 = vpop.f32.mrf.mxu1 }
  0xc4   : > { %v647_v9 = vpop.f32.mrf.mxu0  ;;  %v684_v10 = vadd.f32 %v1495_v6, %v683_v8 }
  0xc5   : > { %v648_v11 = vadd.f32 %v1496_v7, %v647_v9 }
  0xc6   : > { %v1943_v12 = vpack.c.bf16 %v684_v10, %v684_v10 }
  0xc7   : > { %v687_v13 = vmul.f32 0.35355338, %v648_v11 }
  0xc8   : > { %700 = vrot.lane.b32.xlu1 %v1943_v12, %s1713_s28  ;;  %698 = vrot.lane.b32.xlu0 %v1943_v12, %s1714_s10  ;;  %v709_v15 = vsel %vm704_vm1, %v1943_v12, 0  ;;  %v829_v59 = vunpack.c.l.b16 %v1943_v12 }
  0xc9   : > { %v688_v14 = vpack.c.bf16 %v687_v13, %v687_v13  ;;  %718 = vmatpush.bf16.xpose.msra.mxu2 %v709_v15 }
  0xca   : > { %v830_v61 = vpack.c.b16 %v829_v59, %v829_v59 }
  0xcb   : > { %692 = vrot.lane.b32.xlu2 %v688_v14, %s1713_s28  ;;  %v685_v16 = vpop.f32.mrf.mxu1  ;;  %s2125_s28 = sld [smem:[#allocation25_spill]] }
  0xcc   : > { %v649_v17 = vpop.f32.mrf.mxu0 }
  0xd0   : > { %702 = vrot.lane.b32.xlu1 %v1943_v12, %s1715_s13  ;;  %690 = vrot.lane.b32.xlu0 %v688_v14, %s1714_s10 }
  0xd1   : > { %1347 = vmatmul.msk.bf16.vlgmr.msra.gmra.mxu2 %vm704_vm1, %v688_v14 }
  0xd3   : > { %694 = vrot.lane.b32.xlu2 %v688_v14, %s1715_s13 }
 0x125   : > { %v693_v22 = vpop.permute.xlu2 %692 }
 0x12d   : > { %v695_v26 = vpop.permute.xlu2 %694 }
 0x13a   : > { %v701_v18 = vpop.permute.xlu1 %700  ;;  %v699_v19 = vpop.permute.xlu0 %698 }
 0x13b   : > { %v728_v20 = vsel %vm704_vm1, %v699_v19, 0  ;;  %v747_v21 = vsel %vm704_vm1, %v701_v18, 0  ;;  %v876_v54 = vunpack.c.l.b16 %v701_v18  ;;  %v853_v55 = vunpack.c.l.b16 %v699_v19 }
 0x13c   : > { %737 = vmatpush.bf16.xpose.msra.mxu3 %v728_v20  ;;  %756 = vmatpush.bf16.xpose.msrb.mxu0 %v747_v21 }
 0x13d   : > { %v877_v56 = vpack.c.b16 %v876_v54, %v876_v54  ;;  %v854_v57 = vpack.c.b16 %v853_v55, %v853_v55 }
 0x142   : > { %v703_v23 = vpop.permute.xlu1 %702  ;;  %v691_v24 = vpop.permute.xlu0 %690 }
 0x143   : > { %1348 = vmatmul.msk.bf16.vlgmr.msra.gmra.mxu3 %vm704_vm1, %v691_v24  ;;  %1349 = vmatmul.msk.bf16.vlgmr.msrb.gmra.mxu0 %vm704_vm1, %v693_v22  ;;  %v766_v25 = vsel %vm704_vm1, %v703_v23, 0  ;;  %v899_v58 = vunpack.c.l.b16 %v703_v23 }
 0x144   : > { %775 = vmatpush.bf16.xpose.msrb.mxu1 %v766_v25 }
 0x145   : > { %v900_v60 = vpack.c.b16 %v899_v58, %v899_v58 }
 0x14b   : > { %1350 = vmatmul.msk.bf16.vlgmr.msrb.gmra.mxu1 %vm704_vm1, %v695_v26 }
 0x154   : > { %v720_v27 = vpop.f32.mrf.mxu2 }
 0x155   : > { %v781_v38 = vsel %vm704_vm1, %v720_v27, -inf }
 0x15c   : > { %v722_v28 = vpop.f32.mrf.mxu2 }
 0x1c0   : > { %v758_v29 = vpop.f32.mrf.mxu0 }
 0x1c1   : > { %v787_v30 = vsel %vm704_vm1, %v758_v29, -inf }
 0x1c2   : > { %788 = vmax.xlane.f32.xlu1 %v787_v30 }
 0x1c6   : > { %v739_v31 = vpop.f32.mrf.mxu3 }
 0x1c7   : > { %v784_v32 = vsel %vm704_vm1, %v739_v31, -inf }
 0x1c8   : > { %v760_v33 = vpop.f32.mrf.mxu0  ;;  %v777_v34 = vpop.f32.mrf.mxu1  ;;  %785 = vmax.xlane.f32.xlu0 %v784_v32 }
 0x1c9   : > { %v790_v35 = vsel %vm704_vm1, %v777_v34, -inf }
 0x1ca   : > { %791 = vmax.xlane.f32.xlu2 %v790_v35 }
 0x1ce   : > { %v741_v36 = vpop.f32.mrf.mxu3 }
 0x1cf   : > { %v1400_v36 = vld [vmem:[%s2078_s6 + $0x8] sm:$0xff] }
 0x1d0   : > { %v779_v37 = vpop.f32.mrf.mxu1 }
 0x1d1   : > { %v1399_v37 = vld [vmem:[%s2078_s6] sm:$0xff] }
 0x1d2   : > { %782 = vmax.xlane.f32.xlu2 %v781_v38 }
 0x235   : > { %v789_v39 = vpop.xlane.xlu1 %788 }
 0x236   : > { %v795_v40 = vsub.f32 %v758_v29, %v789_v39 }
 0x238   : > { %v801_v41 = vmul.f32 1.442695, %v795_v40 }
 0x23a   : > { %1504 = vpow2.f32 %v801_v41 }
 0x23b   : > { %v786_v42 = vpop.xlane.xlu0 %785 }
 0x23c   : > { %v794_v43 = vsub.f32 %v739_v31, %v786_v42 }
 0x23d   : > { %v792_v44 = vpop.xlane.xlu2 %791 }
 0x23e   : > { %v799_v45 = vmul.f32 1.442695, %v794_v43  ;;  %v796_v46 = vsub.f32 %v777_v34, %v792_v44 }
 0x240   : > { %v1505_v47 = vpop.eup %1504  ;;  %1506 = vpow2.f32 %v799_v45  ;;  %v803_v48 = vmul.f32 1.442695, %v796_v46  ;;  %v1497_v45 = vld [vmem:[%s2079_s7] ss:$0 sm:$0xff]  ;;  %v976_v46 = vunpack.c.l.bf16 %v1932_v5 }
 0x241   : > { %v811_v49 = vsel %vm704_vm1, %v1505_v47, 0.0 }
 0x242   : > { %1508 = vpow2.f32 %v803_v48  ;;  %812 = vadd.xlane.f32.xlu1 %v811_v49 }
 0x245   : > { %v783_v62 = vpop.xlane.xlu2 %782 }
 0x246   : > { %v1507_v50 = vpop.eup %1506  ;;  %v793_v63 = vsub.f32 %v720_v27, %v783_v62 }
 0x247   : > { %v808_v51 = vsel %vm704_vm1, %v1507_v50, 0.0 }
 0x248   : > { %v1509_v52 = vpop.eup %1508  ;;  %809 = vadd.xlane.f32.xlu0 %v808_v51  ;;  %v797_v0 = vmul.f32 1.442695, %v793_v63  ;;  %v1402_v63 = vld [vmem:[#allocation7 + $0x8] sm:$0xff] }
 0x249   : > { %v814_v53 = vsel %vm704_vm1, %v1509_v52, 0.0 }
 0x24a   : > { %815 = vadd.xlane.f32.xlu2 %v814_v53  ;;  %1510 = vpow2.f32 %v797_v0  ;;  %v1401_v0 = vld [vmem:[#allocation7] sm:$0xff] }
 0x250   : > { %v1511_v1 = vpop.eup %1510 }
 0x251   : > { %v805_v2 = vsel %vm704_vm1, %v1511_v1, 0.0 }
 0x25b   : > { %878 = vrot.lane.b32.xlu1 %v877_v56, %s1716_s14 }
 0x25c   : > { %855 = vrot.lane.b32.xlu0 %v854_v57, %s1716_s14 }
 0x262   : > { %901 = vrot.lane.b32.xlu2 %v900_v60, %s1716_s14 }
 0x263   : > { %831 = vrot.lane.b32.xlu1 %v830_v61, %s1716_s14  ;;  %s2126_s14 = sld [smem:[#allocation26_spill]] }
 0x286   : > { %806 = vadd.xlane.f32.xlu0 %v805_v2 }
 0x2b5   : > { %v813_v4 = vpop.xlane.xlu1 %812 }
 0x2bb   : > { %v810_v6 = vpop.xlane.xlu0 %809 }
 0x2bd   : > { %v816_v3 = vpop.xlane.xlu2 %815 }
 0x2be   : > { %1512 = vrcp.f32 %v816_v3 }
 0x2bf   : > { %1514 = vrcp.f32 %v813_v4 }
 0x2c0   : > { %1516 = vrcp.f32 %v810_v6 }
 0x2c4   : > { %v1513_v7 = vpop.eup %1512 }
 0x2c5   : > { %v824_v8 = vmul.f32 %v1513_v7, %v1509_v52  ;;  %v902_v9 = vpop.permute.xlu2 %901  ;;  %v1515_v12 = vpop.eup %1514  ;;  %v1720_v52 = vmov 32.0  }
 0x2c6   : > { %v907_v10 = vsel %vm836_vm2, %v902_v9, 0  ;;  %v1517_v13 = vpop.eup %1516  ;;  %v823_v14 = vmul.f32 %v1515_v12, %v1505_v47 }
 0x2c7   : > { %v828_v11 = vpack.c.bf16 %v824_v8, %v824_v8  ;;  %916 = vmatpush.bf16.msra.mxu1 %v907_v10  ;;  %v822_v15 = vmul.f32 %v1517_v13, %v1507_v50  ;;  %v1499_v13 = vld [vmem:[%s2124_s19] ss:$0 sm:$0xff]  ;;  %s2129_s19 = sld [smem:[#allocation28_spill]] }
 0x2c8   : > { %v827_v20 = vpack.c.bf16 %v823_v14, %v823_v14 }
 0x2c9   : > { %v826_v21 = vpack.c.bf16 %v822_v15, %v822_v15 }
 0x2ca   : > { %1354 = vmatmul.msk.bf16.vlgmr.msra.gmra.mxu1 %vm704_vm1, %v828_v11  ;;  %v1498_v11 = vld [vmem:[%s2123_s17] ss:$0 sm:$0xff]  ;;  %s1392_s17 = sshll.u32 %s2128_s25, 3 }
 0x2cd   : > { %v879_v16 = vpop.permute.xlu1 %878 }
 0x2ce   : > { %v884_v17 = vsel %vm836_vm2, %v879_v16, 0  ;;  %v856_v18 = vpop.permute.xlu0 %855 }
 0x2cf   : > { %893 = vmatpush.bf16.msra.mxu0 %v884_v17  ;;  %v861_v19 = vsel %vm836_vm2, %v856_v18, 0  ;;  %v1500_v18 = vld [vmem:[%s2125_s28] ss:$0 sm:$0xff]  ;;  %s2130_s28 = sld [smem:[#allocation30_spill]] }
 0x2d0   : > { %870 = vmatpush.bf16.msrb.mxu3 %v861_v19 }
 0x2d2   : > { %1353 = vmatmul.msk.bf16.vlgmr.msra.gmra.mxu0 %vm704_vm1, %v827_v20 }
 0x2d3   : > { %1352 = vmatmul.msk.bf16.vlgmr.msrb.gmra.mxu3 %vm704_vm1, %v826_v21 }
 0x2d4   : > { %1047 = vmatpush.bf16.msra.mxu3 %v1402_v63 }
 0x2d5   : > { %v832_v22 = vpop.permute.xlu1 %831  ;;  %s1198_s10 = scalar_lea.hbm %s2130_s28, %s1392_s17  ;;  %s1638_s0 = scalar_lea.hbm %s2130_s28, 16 }
 0x2d6   : > { %v838_v23 = vsel %vm836_vm2, %v832_v22, 0  ;;  %s1202_s12 = sshll.u32 %s1198_s10, 4  ;;  %s1203_s12 = int_to_ptr.hbm [resolvable:$true] %s1202_s12 }
 0x2d7   : > { %847 = vmatpush.bf16.msrb.mxu2 %v838_v23  ;;  %s1632_s21 = sshra.s32 %s1203_s12, 4  ;;  %s1633_s21 = int_to_ptr.hbm [resolvable:$true] %s1632_s21 }
 0x2d8   : > { %1048 = vmatpush.bf16.msra.mxu3 %v1401_v0  ;;  %p1639_p10 = scmp.lt.s32.totalorder %s1633_s21, %s2130_s28 }
 0x2db   : > { %969 = vmatpush.bf16.msra.mxu2 %v1400_v36 }
 0x2df   : > { %970 = vmatpush.bf16.msra.mxu2 %v1399_v37 }
 0x2f9   : > { %v807_v24 = vpop.xlane.xlu0 %806 }
 0x2fa   : > { %1518 = vrcp.f32 %v807_v24 }
 0x2fb   : > { %1520 = vrcp.f32 %v1720_v52 }
 0x300   : > { %v1519_v25 = vpop.eup %1518 }
 0x301   : > { %v821_v26 = vmul.f32 %v1519_v25, %v1511_v1  ;;  %v1521_v53 = vpop.eup %1520  ;;  %v1406_v25 = vld [vmem:[%s2126_s14 + $0x18] sm:$0xff] }
 0x302   : > { %v984_v54 = vmul.f32 32.0, %v1521_v53  ;;  %vm988_vm5 = vweird.f32 %v1521_v53  ;;  %1143 = vmatpush.bf16.msrb.mxu0 %v1406_v25 }
 0x303   : > { %v825_v27 = vpack.c.bf16 %v821_v26, %v821_v26 }
 0x304   : > { %v985_v55 = vsub.f32 1.0, %v984_v54 }
 0x305   : > { %1351 = vmatmul.msk.bf16.vlgmr.msrb.gmra.mxu2 %vm704_vm1, %v825_v27 }
 0x306   : > { %v986_v56 = vmul.f32 %v1521_v53, %v985_v55 }
 0x308   : > { %v987_v57 = vadd.f32 %v1521_v53, %v986_v56 }
 0x30a   : > { %v1987_v58 = vsel %vm988_vm5, %v1521_v53, %v987_v57 }
 0x347   : > { %v918_v28 = vpop.f32.mrf.mxu1 }
 0x34f   : > { %v895_v29 = vpop.f32.mrf.mxu0  ;;  %v920_v30 = vpop.f32.mrf.mxu1 }
 0x350   : > { %927 = vrot.lane.b32.xlu1 %v895_v29, %s1717_s29  ;;  %v1405_v30 = vld [vmem:[%s2126_s14 + $0x10] sm:$0xff] }
 0x351   : > { %1144 = vmatpush.bf16.msrb.mxu0 %v1405_v30 }
 0x356   : > { %v872_v31 = vpop.f32.mrf.mxu3 }
 0x357   : > { %v897_v32 = vpop.f32.mrf.mxu0  ;;  %923 = vrot.lane.b32.xlu2 %v872_v31, %s1718_s15 }
 0x35e   : > { %v874_v33 = vpop.f32.mrf.mxu3 }
 0x35f   : > { %931 = vrot.lane.b32.xlu2 %v918_v28, %s1719_s8  ;;  %s2132_s8 = sld [smem:[#allocation29_spill]] }
 0x365   : > { %v1503_v25 = vld [vmem:[%s2132_s8] ss:$0 sm:$0xff] }
 0x388   : > { %v849_v34 = vpop.f32.mrf.mxu2 }
 0x390   : > { %v851_v35 = vpop.f32.mrf.mxu2 }
 0x391   : > { %v1404_v35 = vld [vmem:[%s2126_s14 + $0x8] sm:$0xff] }
 0x392   : > { %1145 = vmatpush.bf16.msrb.mxu0 %v1404_v35 }
 0x3b1   : > { %v924_v38 = vpop.permute.xlu2 %923 }
 0x3b2   : > { %v934_v39 = vsel %vm704_vm1, %v849_v34, %v924_v38 }
 0x3b9   : > { %v932_v41 = vpop.permute.xlu2 %931 }
 0x3c2   : > { %v928_v40 = vpop.permute.xlu1 %927 }
 0x3c3   : > { %v936_v42 = vsel %vm935_vm3, %v934_v39, %v928_v40  ;;  %v1403_v39 = vld [vmem:[%s2126_s14] sm:$0xff] }
 0x3c4   : > { %v938_v43 = vsel %vm937_vm4, %v936_v42, %v932_v41  ;;  %1146 = vmatpush.bf16.msrb.mxu0 %v1403_v39 }
 0x3c5   : > { %v939_v44 = vpack.c.bf16 %v938_v43, %v938_v43 }
 0x3c7   : > { %1363 = vmatmul.msk.bf16.vlgmr.msra.gmra.mxu2 %vm634_vm0, %v939_v44 }
 0x44a   : > { %v972_v47 = vpop.f32.mrf.mxu2 }
 0x44b   : > { %v973_v48 = vadd.f32 %v1497_v45, %v972_v47 }
 0x44d   : > { %v977_v49 = vadd.f32 %v976_v46, %v973_v48 }
 0x44f   : > { %v980_v50 = vsel %vm634_vm0, %v977_v49, 0.0 }
 0x450   : > { %981 = vadd.xlane.f32.xlu1 %v980_v50 }
 0x452   : > { %v974_v51 = vpop.f32.mrf.mxu2 }
 0x4c3   : > { %v982_v59 = vpop.xlane.xlu1 %981 }
 0x4c4   : > { %v990_v5 = vmul.f32 %v1987_v58, %v982_v59 }
 0x4c6   : > { %v991_v60 = vsub.f32 %v977_v49, %v990_v5 }
 0x4c8   : > { %v992_v61 = vmul.f32 %v991_v60, %v991_v60 }
 0x4ca   : > { %v993_v62 = vsel %vm634_vm0, %v992_v61, 0.0 }
 0x4cb   : > { %994 = vadd.xlane.f32.xlu2 %v993_v62 }
 0x53e   : > { %v995_v1 = vpop.xlane.xlu2 %994 }
 0x53f   : > { %v996_v2 = vmul.f32 %v995_v1, %v1987_v58 }
 0x541   : > { %v997_v3 = vadd.f32 1e-05, %v996_v2  ;;  %v1501_v2 = vld [vmem:[%s2127_s23] ss:$0 sm:$0xff]  ;;  %s1634_s23 = scalar_lea.hbm %s1633_s21, 8 }
 0x542   : > { %p1635_p1 = scmp.ne.s32.totalorder %s1633_s21, %s1634_s23  ;;  %p1640_p11 = scmp.lt.s32.totalorder %s1638_s0, %s1634_s23 }
 0x543   : > { %1522 = vrsqrt.f32 %v997_v3  ;;  %vm1004_vm7 = vweird.f32 %v997_v3 }
 0x544   : > { %p1636_p3 = pnand %p1635_p1, %p1877_p4  ;;  %p1641_p12 = por %p1640_p11, %p1639_p10 }
 0x546   : > { %p1637_p9 = pneg %p1636_p3 }
 0x548   : > { %p1642_p13 = pnand %p1641_p12, %p1637_p9 }
 0x549   : > { %v1523_v4 = vpop.eup %1522 }
 0x54a   : > { %v999_v6 = vmul.f32 %v1523_v4, %v997_v3  ;;  %vm1005_vm6 = vweird.f32 %v1523_v4 }
 0x54b   : > { %vm1006_vm8 = vmor %vm1004_vm7, %vm1005_vm6 }
 0x54c   : > { %v1000_v7 = vmul.f32 %v1523_v4, %v999_v6 }
 0x54e   : > { %v1001_v8 = vmul.f32 0.5, %v1000_v7 }
 0x550   : > { %v1002_v9 = vsub.f32 1.5, %v1001_v8 }
 0x552   : > { %v1003_v10 = vmul.f32 %v1523_v4, %v1002_v9 }
 0x554   : > { %v1007_v12 = vsel %vm1006_vm8, %v1523_v4, %v1003_v10 }
 0x555   : > { %v1008_v14 = vmul.f32 %v1007_v12, %v991_v60 }
 0x557   : > { %v1012_v15 = vmul.f32 %v1498_v11, %v1008_v14 }
 0x559   : > { %v1998_v16 = vadd.f32 %v1499_v13, %v1012_v15 }
 0x55b   : > { %v1017_v17 = vpack.c.bf16 %v1998_v16, %v1998_v16 }
 0x55d   : > { %1372 = vmatmul.msk.bf16.vlgmr.msra.gmra.mxu3 %vm634_vm0, %v1017_v17 }
 0x5e0   : > { %v1050_v19 = vpop.f32.mrf.mxu3 }
 0x5e1   : > { %v1051_v20 = vadd.f32 %v1500_v18, %v1050_v19 }
 0x5e3   : > { %v1055_v21 = vmul.f32 0.70710677, %v1051_v20  ;;  %v1054_v62 = vmul.f32 0.5, %v1051_v20 }
 0x5e5   : > { %v1056_v22 = vmul.f32 %v1055_v21, %v1055_v21 }
 0x5e7   : > { %v1057_v23 = vmin.f32 %v1056_v22, 16.0 }
 0x5e8   : > { %v1052_v24 = vpop.f32.mrf.mxu3 }
 0x5e9   : > { %v1058_v26 = vmul.f32 2.1237322e-06, %v1057_v23  ;;  %v1069_v27 = vmul.f32 3.8918573e-05, %v1057_v23 }
 0x5eb   : > { %v1059_v28 = vadd.f32 0.00028619796, %v1058_v26  ;;  %v1070_v29 = vadd.f32 0.001143296, %v1069_v27 }
 0x5ed   : > { %v1060_v31 = vmul.f32 %v1059_v28, %v1057_v23  ;;  %v1071_v32 = vmul.f32 %v1070_v29, %v1057_v23 }
 0x5ef   : > { %v1072_v33 = vadd.f32 0.014752088, %v1071_v32  ;;  %v1061_v34 = vadd.f32 0.0036580483, %v1060_v31 }
 0x5f1   : > { %v1073_v36 = vmul.f32 %v1072_v33, %v1057_v23  ;;  %v1062_v38 = vmul.f32 %v1061_v34, %v1057_v23 }
 0x5f3   : > { %v1074_v37 = vadd.f32 0.112945676, %v1073_v36  ;;  %v1063_v42 = vadd.f32 0.05243302, %v1062_v38 }
 0x5f5   : > { %v1075_v40 = vmul.f32 %v1074_v37, %v1057_v23  ;;  %v1064_v45 = vmul.f32 %v1063_v42, %v1057_v23 }
 0x5f7   : > { %v1076_v41 = vadd.f32 0.4994258, %v1075_v40  ;;  %v1065_v46 = vadd.f32 0.18741608, %v1064_v45 }
 0x5f9   : > { %v1077_v43 = vmul.f32 %v1076_v41, %v1057_v23  ;;  %v1066_v48 = vmul.f32 %v1065_v46, %v1057_v23  ;;  %v1502_v23 = vld [vmem:[%s2129_s19] ss:$0 sm:$0xff] }
 0x5fb   : > { %v1078_v44 = vadd.f32 1.0, %v1077_v43  ;;  %v1067_v52 = vadd.f32 1.1283791, %v1066_v48 }
 0x5fd   : > { %1524 = vrcp.f32 %v1078_v44  ;;  %v1090_v51 = vand.u32 2147483648, %v1078_v44  ;;  %v1088_v54 = vand.u32 2147483647, %v1078_v44  ;;  %vm1084_vm10 = vweird.f32 %v1078_v44 }
 0x5fe   : > { %v1068_v57 = vmul.f32 %v1067_v52, %v1055_v21 }
 0x5ff   : > { %v1091_v56 = vor.u32 1.1754944e-38, %v1090_v51  ;;  %vm1089_vm12 = vcmp.eq.f32.partialorder %v1088_v54, 8.507059e+37 }
 0x603   : > { %v1525_v47 = vpop.eup %1524 }
 0x604   : > { %v1080_v49 = vmul.f32 %v1525_v47, %v1078_v44  ;;  %vm1085_vm9 = vweird.f32 %v1525_v47 }
 0x605   : > { %vm1086_vm11 = vmor %vm1084_vm10, %vm1085_vm9 }
 0x606   : > { %v1081_v50 = vsub.f32 1.0, %v1080_v49 }
 0x608   : > { %v1082_v53 = vmul.f32 %v1525_v47, %v1081_v50 }
 0x60a   : > { %v1083_v55 = vadd.f32 %v1525_v47, %v1082_v53 }
 0x60c   : > { %v1087_v59 = vsel %vm1086_vm11, %v1525_v47, %v1083_v55 }
 0x60d   : > { %v1092_v5 = vsel %vm1089_vm12, %v1091_v56, %v1087_v59 }
 0x60e   : > { %v1093_v60 = vmul.f32 %v1092_v5, %v1068_v57 }
 0x610   : > { %v1373_v61 = vclamps-f32 %v1093_v60, 1.0 }
 0x612   : > { %v1096_v63 = vadd.f32 1.0, %v1373_v61 }
 0x614   : > { %v1097_v0 = vmul.f32 %v1096_v63, %v1054_v62 }
 0x616   : > { %v1098_v1 = vpack.c.bf16 %v1097_v0, %v1097_v0 }
 0x618   : > { %1390 = vmatmul.msk.bf16.vlgmr.msrb.gmra.mxu0 %vm1135_vm13, %v1098_v1 }
 0x695   : > { %v1148_v3 = vpop.f32.mrf.mxu0 }
 0x696   : > { %v1149_v4 = vadd.f32 %v1501_v2, %v1148_v3 }
 0x698   : > { %v1152_v6 = vadd.f32 %v1149_v4, %v1998_v16 }
 0x69a   : > { %v1155_v7 = vsel %vm634_vm0, %v1152_v6, 0.0 }
 0x69b   : > { %1156 = vadd.xlane.f32.xlu0 %v1155_v7 }
 0x69d   : > { %v1150_v8 = vpop.f32.mrf.mxu0 }
 0x70e   : > { %v1157_v9 = vpop.xlane.xlu0 %1156 }
 0x70f   : > { %v1158_v10 = vmul.f32 %v1157_v9, %v1987_v58 }
 0x711   : > { %v1159_v11 = vsub.f32 %v1152_v6, %v1158_v10 }
 0x713   : > { %v1160_v12 = vmul.f32 %v1159_v11, %v1159_v11 }
 0x715   : > { %v1161_v13 = vsel %vm634_vm0, %v1160_v12, 0.0 }
 0x716   : > { %1162 = vadd.xlane.f32.xlu0 %v1161_v13 }
 0x789   : > { %v1163_v14 = vpop.xlane.xlu0 %1162 }
 0x78a   : > { %v1164_v15 = vmul.f32 %v1163_v14, %v1987_v58 }
 0x78c   : > { %v1165_v17 = vadd.f32 1e-05, %v1164_v15 }
 0x78e   : > { %1526 = vrsqrt.f32 %v1165_v17  ;;  %vm1172_vm15 = vweird.f32 %v1165_v17 }
 0x794   : > { %v1527_v16 = vpop.eup %1526 }
 0x795   : > { %v1167_v18 = vmul.f32 %v1527_v16, %v1165_v17  ;;  %vm1173_vm14 = vweird.f32 %v1527_v16 }
 0x796   : > { %vm1174_vm1 = vmor %vm1172_vm15, %vm1173_vm14 }
 0x797   : > { %v1168_v19 = vmul.f32 %v1527_v16, %v1167_v18 }
 0x799   : > { %v1169_v20 = vmul.f32 0.5, %v1168_v19 }
 0x79b   : > { %v1170_v21 = vsub.f32 1.5, %v1169_v20 }
 0x79d   : > { %v1171_v22 = vmul.f32 %v1527_v16, %v1170_v21 }
 0x79f   : > { %v1175_v58 = vsel %vm1174_vm1, %v1527_v16, %v1171_v22 }
 0x7a0   : > { %v1176_v24 = vmul.f32 %v1175_v58, %v1159_v11 }
 0x7a2   : > { %v1180_v26 = vmul.f32 %v1502_v23, %v1176_v24 }
 0x7a4   : > { %v1184_v27 = vadd.f32 %v1503_v25, %v1180_v26 }
 0x7a6   : > { %1185 = vst.msk [vmem:[%s610_s9] sm:$0xff] %vm634_vm0, %v1184_v27 }
 0x7a7   : > { %1645 = shalt.err (!%p1642_p13)
}
 0x7a8   : > { %1415 = dma.vmem_to_hbm [thread:$0]  (%p1877_p4), %s1201_s11, 128, %s1203_s12, %s1187_s16  }
 0x7a9 PF: > { %s2133_s24 = sld [smem:[#allocation13_spill]]  ;;  %p1429_p0 = pnand %p1319_p6, %p1885_p7 }
 0x7ab   : > { %p1430_p2 = pneg %p1429_p0 }
 0x7af   : > { %s1214_s20 = sand.u32 1, %s2133_s24  }
 0x7b0   : > { %s1215_s18 = scalar_lea.sflag [#allocation4], %s1214_s20 }
 0x7b1   : > { %1683 = dma.done.wait (%p1430_p2), %s1215_s18, 128  }
 0x7b2   : > { %1685 = vsyncadd (%p1430_p2), %s1215_s18, 4294967168  ;;  %s35_s26 = sadd.s32 1, %s1708_s26   ;;  %s2135_s10 = sld [smem:[#allocation14_spill]] }
 0x7b3   : > { %p32_p5 = scmp.ge.s32.totalorder %s35_s26, 4   ;;  %s2136_s23 = sld [smem:[#allocation19_spill]] }
 0x7b4   : > { %s2137_s24 = sld [smem:[#allocation16_spill]]  ;;  %s2139_s21 = smov %s1692_s22 }
 0x7b5   : > { %s2138_s25 = sld [smem:[#allocation17_spill]]  ;;  %34 = sbr.rel (!%p32_p5) target bundleno = 19 (0x13), region = 146 }
 0x7b8   : > { %s2140_s22 = smov %s2135_s10 }
 0x7ba   :  { %1221 = vsyncpa [#allocation3], 1 }
 0x7bb   :  { %1223 = vsyncpa [#allocation3 + $0x1], 1 }
 0x7bc   :  { %1224 = vsyncpa [#allocation6], 1 }
 0x7bd   :  { %1226 = vsyncpa [#allocation6 + $0x1], 1 }
 0x7be   :  { %1227 = vsyncpa [#allocation4], 1 }
 0x7bf   :  { %1229 = vsyncpa [#allocation4 + $0x1], 1 }

</bundles_post_ra>
